<compile_context>
chip_gen: v6e
topology: v6e:2x2x1
jax: 0.10.0
libtpu: 0.0.40
codegen_flags: <defaults>
</compile_context>

<pallas_src>
import math
from functools import partial

import jax
import jax.numpy as jnp
from jax.experimental import pallas as pl
from jax.experimental.pallas import tpu as pltpu


# ----------------------------------------------------------------------------- helpers

def _round_up(a, b):
    return (a + b - 1) // b * b


def _gelu_tanh(x):
    # "gelu_new" / "gelu_pytorch_tanh": tanh routes to the EUP (separate VLIW slot).
    c = math.sqrt(2.0 / math.pi)
    return 0.5 * x * (1.0 + jnp.tanh(c * (x + 0.044715 * x * x * x)))


def _gelu_erf(x):
    # exact (erf) GELU == transformers ACT2FN["gelu"] (GPT-NeoX default hidden_act)
    return 0.5 * x * (1.0 + jax.lax.erf(x * (1.0 / math.sqrt(2.0))))


_TARGET_TENSORCORES = 2          # v7x megacore; harmless over-split on 1-TC v5e/v6e


def _vmem_budget_bytes():
    """Generation-aware VMEM cap: ~7/8 of physical (≈56 MiB v7x, ≈112 MiB v5e/v6e)."""
    cap = 64 << 20
    try:
        cap = int(getattr(pltpu.get_tpu_info(), "vmem_capacity_bytes", cap))
    except Exception:
        pass
    return (cap // 8) * 7


_SINGLE_BUFFER_OK = None


def _single_buffer_supported():
    """True iff BlockSpec(pipeline_mode=pl.Buffered(1)) exists AND lowers on this backend."""
    global _SINGLE_BUFFER_OK
    if _SINGLE_BUFFER_OK is not None:
        return _SINGLE_BUFFER_OK
    try:
        inv = pl.BlockSpec((8, 128), lambda i: (0, 0), pipeline_mode=pl.Buffered(1))

        def _probe(a_ref, o_ref):
            o_ref[...] = a_ref[...] + jnp.float32(1.0)

        fn = pl.pallas_call(
            _probe,
            out_shape=jax.ShapeDtypeStruct((16, 128), jnp.float32),
            grid=(2,),
            in_specs=[inv],
            out_specs=pl.BlockSpec((8, 128), lambda i: (i, 0)),
        )
        jax.jit(fn).lower(jax.ShapeDtypeStruct((8, 128), jnp.float32)).compile()
        _SINGLE_BUFFER_OK = True
    except Exception:
        _SINGLE_BUFFER_OK = False        # older API: fall back to default double-buffering
    return _SINGLE_BUFFER_OK


def _invariant_spec(shape):
    """Spec for a grid-invariant (resident) operand: constant index_map -> fetched once.
    Single-buffered where supported (no point double-buffering a never-changing block)."""
    index_map = lambda i: (0,) * len(shape)
    if _single_buffer_supported():
        return pl.BlockSpec(shape, index_map, pipeline_mode=pl.Buffered(1))
    return pl.BlockSpec(shape, index_map)


# ----------------------------------------------------------------------------- kernel

def fused_mlp_kernel(x_ref, w1t_ref, w2t_ref, b2_ref, wdt_ref, wut_ref, bu_ref,
                     y_ref, idx_ref, act_ref, *, k, approx_gelu):
    """x[TN,H] -> encoder -> GELU -> top-k -> low-rank decode, all resident in VMEM."""
    cdt = w1t_ref.dtype                      # MXU operand dtype (bf16 or f32)

    # ---- encoder: (x @ W1^T) @ W2^T + b2, f32 accumulation on the MXU ----
    x = x_ref[...].astype(cdt)               # cast in-kernel (no host-side copy of x)
    h = jnp.dot(x, w1t_ref[...], preferred_element_type=jnp.float32)          # [TN, H8]
    pre = jnp.dot(h.astype(cdt), w2t_ref[...],
                  preferred_element_type=jnp.float32)                         # [TN, F]
    pre = pre + b2_ref[...]
    pre = _gelu_tanh(pre) if approx_gelu else _gelu_erf(pre)                  # f32

    tn, f = pre.shape
    iota_f = jax.lax.broadcasted_iota(jnp.int32, (tn, f), 1)   # hoisted out of the k-loop
    iota_k = jax.lax.broadcasted_iota(jnp.int32, (tn, k), 1)
    neg_inf = jnp.float32(-jnp.inf)

    # ---- in-kernel top-k: k unrolled passes of row-max + knockout (k small & static) ----
    work = pre
    top_idx = jnp.zeros((tn, k), jnp.int32)
    top_act = jnp.zeros((tn, k), jnp.float32)
    for j in range(k):
        m = jnp.max(work, axis=-1, keepdims=True)                              # [TN, 1]
        idx_j = jnp.max(jnp.where(work == m, iota_f, -1),
                        axis=-1, keepdims=True)                                # [TN, 1]
        work = jnp.where(iota_f == idx_j, neg_inf, work)    # knock out exactly one position
        top_idx = jnp.where(iota_k == j, idx_j, top_idx)
        top_act = jnp.where(iota_k == j, m, top_act)

    # Sparse code matrix built ONCE after the loop: the selected positions are exactly
    # the knocked-out (-inf) ones.  (Saves k full [TN,F] selects on the binding VALU slot.)
    codes = jnp.where(work == neg_inf, pre, jnp.float32(0.0))                  # [TN, F]

    # ---- low-rank decode: (codes @ W_down^T) @ W_up^T + b_up, f32 accumulation ----
    z = jnp.dot(codes.astype(cdt), wdt_ref[...],
                preferred_element_type=jnp.float32)                            # [TN, H8]
    y = jnp.dot(z.astype(cdt), wut_ref[...],
                preferred_element_type=jnp.float32)                            # [TN, H]

    y_ref[...] = (y + bu_ref[...]).astype(y_ref.dtype)
    idx_ref[...] = top_idx
    act_ref[...] = top_act


# ----------------------------------------------------------------------------- wrapper

def prepare_weights(params, compute_dtype=jnp.bfloat16):
    """One-time weight prep (transpose + cast). Do NOT call per forward step."""
    return {
        "w1t": params["w_enc1"].T.astype(compute_dtype),        # [H,  H8]
        "w2t": params["w_enc2"].T.astype(compute_dtype),        # [H8, F ]
        "b2":  params["b_enc2"].reshape(1, -1).astype(jnp.float32),
        "wdt": params["w_dec_down"].T.astype(compute_dtype),    # [F,  H8]
        "wut": params["w_dec_up"].T.astype(compute_dtype),      # [H8, H ]
        "bu":  params["b_dec_up"].reshape(1, -1).astype(jnp.float32),
    }


def sparse_low_rank_mlp(x, weights, *, k, token_tile=256, hidden_act="gelu_tanh"):
    """Fused SparseLowRankMLP forward. x: [B, S, H] -> dict(hidden_states, top_indices, top_acts)."""
    if hidden_act in ("gelu_tanh", "gelu_new", "gelu_pytorch_tanh", "gelu_fast"):
        approx = True
    elif hidden_act == "gelu":
        approx = False
    else:
        raise ValueError(f"unsupported hidden_act: {hidden_act}")

    B, S, H = x.shape
    N = B * S
    H8 = weights["w1t"].shape[1]
    F = weights["w2t"].shape[1]
    cdt = weights["w2t"].dtype
    out_dtype = x.dtype

    w_item = jnp.dtype(cdt).itemsize
    x_item = jnp.dtype(x.dtype).itemsize
    o_item = jnp.dtype(out_dtype).itemsize
    sub = 8 if min(x_item, o_item) >= 4 else 16        # sublane multiple for token-tiled blocks

    # ---- VMEM accounting (resident weights + per-token live bytes) ----
    buf = 1 if _single_buffer_supported() else 2
    weight_bytes = buf * ((H * H8 + H8 * F + F * H8 + H8 * H) * w_item + (F + H) * 4)
    per_token = (
        5 * F * 4 + F * w_item              # pre/work/codes/iota_f + transient (f32) + codes cast
        + 4 * H8 * 4                        # h, z (+ compute-dtype casts)
        + H * (2 * x_item + 2 * o_item + 4)  # double-buffered x / y tiles + f32 y temp
        + 2 * k * (4 + 4) * 2               # idx / act tiles (double-buffered)
    )
    budget = _vmem_budget_bytes()
    headroom = 4 << 20                       # Mosaic internal scratch / semaphores
    avail = max(budget - weight_bytes - headroom, sub * per_token)

    # ---- token tile: VMEM-bounded, MXU-M floor of 128, >= 2 grid steps per TensorCore ----
    n_al = _round_up(N, sub)
    tn_vmem = max(sub, (avail // per_token) // sub * sub)
    tn = min(_round_up(token_tile, sub), n_al, tn_vmem)
    if n_al >= 128:
        tn = max(tn, min(128, tn_vmem))
    steps_target = 2 * _TARGET_TENSORCORES
    if pl.cdiv(N, tn) < steps_target and n_al > sub:
        tn = min(tn, max(sub, _round_up(pl.cdiv(n_al, steps_target), sub)))
    grid = (pl.cdiv(N, tn),)                 # ragged last tile handled by masked block DMA

    vmem_limit = int(min(max(weight_bytes + tn * per_token + headroom, 32 << 20), budget))

    x2d = x.reshape(N, H)                    # no host-side cast / pad

    y, top_idx, top_act = pl.pallas_call(
        partial(fused_mlp_kernel, k=k, approx_gelu=approx),
        out_shape=(
            jax.ShapeDtypeStruct((N, H), out_dtype),
            jax.ShapeDtypeStruct((N, k), jnp.int32),
            jax.ShapeDtypeStruct((N, k), jnp.float32),
        ),
        grid=grid,
        in_specs=[
            pl.BlockSpec((tn, H), lambda i: (i, 0)),    # x tile
            _invariant_spec((H, H8)),                   # W_enc1^T (resident, single-buffered)
            _invariant_spec((H8, F)),                   # W_enc2^T
            _invariant_spec((1, F)),                    # b_enc2
            _invariant_spec((F, H8)),                   # W_down^T
            _invariant_spec((H8, H)),                   # W_up^T
            _invariant_spec((1, H)),                    # b_up
        ],
        out_specs=(
            pl.BlockSpec((tn, H), lambda i: (i, 0)),
            pl.BlockSpec((tn, k), lambda i: (i, 0)),
            pl.BlockSpec((tn, k), lambda i: (i, 0)),
        ),
        compiler_params=pltpu.CompilerParams(
            dimension_semantics=("parallel",),
            vmem_limit_bytes=vmem_limit,
        ),
    )(x2d, weights["w1t"], weights["w2t"], weights["b2"],
      weights["wdt"], weights["wut"], weights["bu"])

    return {
        "hidden_states": y.reshape(B, S, H),
        "top_indices": top_idx.reshape(B, S, k),
        "top_acts": top_act.reshape(B, S, k),
    }


# ----------------------------------------------------------------------------- demo / checks

if __name__ == "__main__":
    # Small config consistent with the module: hidden_size=128 -> H8=16, F=intermediate*8=256
    hidden_size = 128
    intermediate_size = 32
    k_top = 4
    H8 = hidden_size // 8
    F = intermediate_size * 8
    batch, seq = 2, 8
    N = batch * seq

    key = jax.random.PRNGKey(0)
    kx, k1, k2, k3, k4, k5, k6 = jax.random.split(key, 7)
    params = {
        "w_enc1": jax.random.normal(k1, (H8, hidden_size), jnp.float32) * 0.1,
        "w_enc2": jax.random.normal(k2, (F, H8), jnp.float32) * 0.1,
        "b_enc2": jax.random.normal(k3, (F,), jnp.float32) * 0.1,
        "w_dec_down": jax.random.normal(k4, (H8, F), jnp.float32) * 0.1,
        "w_dec_up": jax.random.normal(k5, (hidden_size, H8), jnp.float32) * 0.1,
        "b_dec_up": jax.random.normal(k6, (hidden_size,), jnp.float32) * 0.1,
    }
    x = jax.random.normal(kx, (batch, seq, hidden_size), jnp.float32)

    # -------- exact-precision path (f32 operands, tanh GELU) for the correctness check --------
    prepared_f32 = prepare_weights(params, compute_dtype=jnp.float32)
    out = sparse_low_rank_mlp(x, prepared_f32, k=k_top)      # hidden_act="gelu_tanh" default
    jax.block_until_ready(out)

    HI = jax.lax.Precision.HIGHEST
    x2 = x.reshape(N, hidden_size)
    pre_ref = _gelu_tanh(
        jnp.dot(jnp.dot(x2, params["w_enc1"].T, precision=HI),
                params["w_enc2"].T, precision=HI) + params["b_enc2"])

    ker_vals = out["top_acts"].reshape(N, k_top)
    ker_idx = out["top_indices"].reshape(N, k_top)

    # 1) top-k values match the reference top-k (both descending)
    ref_vals, _ = jax.lax.top_k(pre_ref, k_top)
    assert jnp.allclose(ker_vals, ref_vals, atol=1e-3, rtol=1e-3), (
        float(jnp.max(jnp.abs(ker_vals - ref_vals))))
    # 2) reported activations equal the pre-activations at the reported indices
    gathered_pre = jnp.take_along_axis(pre_ref, ker_idx, axis=-1)
    assert jnp.allclose(ker_vals, gathered_pre, atol=1e-3, rtol=1e-3), (
        float(jnp.max(jnp.abs(ker_vals - gathered_pre))))
    # 3) selected indices are distinct per token
    idx_sorted = jnp.sort(ker_idx, axis=-1)
    assert bool(jnp.all(idx_sorted[:, 1:] > idx_sorted[:, :-1]))
    # 4) low-rank decode matches the reference gather of (W_up @ W_down)
    low_rank = jnp.dot(params["w_dec_up"], params["w_dec_down"], precision=HI)   # [H, F]
    rows = jnp.take(low_rank.T, ker_idx, axis=0)                                 # [N, k, H]
    y_ref = jnp.einsum("nk,nkh->nh", ker_vals, rows, precision=HI) + params["b_dec_up"]
    y_ker = out["hidden_states"].reshape(N, hidden_size)
    assert jnp.allclose(y_ker, y_ref, atol=1e-3, rtol=1e-3), (
        float(jnp.max(jnp.abs(y_ker - y_ref))))
    assert out["top_acts"].shape == (batch, seq, k_top)
    assert out["top_indices"].shape == (batch, seq, k_top)

    # -------- perf config (bf16 operands, f32 accumulate): smoke run --------
    prepared_bf16 = prepare_weights(params)                  # bf16 operands by default
    out_bf16 = sparse_low_rank_mlp(x, prepared_bf16, k=k_top)
    jax.block_until_ready(out_bf16)
    assert out_bf16["hidden_states"].shape == (batch, seq, hidden_size)
    assert bool(jnp.all(jnp.isfinite(out_bf16["hidden_states"])))

    print("KERNEL_OK")
</pallas_src>

<mosaic_0001>
module attributes {stable_mosaic.version = 11 : i64} {
  func.func @fused_mlp_kernel(%arg0: i32, %arg1: memref<8x128xf32, #tpu.memory_space<vmem>>, %arg2: memref<128x16xf32, #tpu.memory_space<vmem>>, %arg3: memref<16x256xf32, #tpu.memory_space<vmem>>, %arg4: memref<1x256xf32, #tpu.memory_space<vmem>>, %arg5: memref<256x16xf32, #tpu.memory_space<vmem>>, %arg6: memref<16x128xf32, #tpu.memory_space<vmem>>, %arg7: memref<1x128xf32, #tpu.memory_space<vmem>>, %arg8: memref<8x128xf32, #tpu.memory_space<vmem>>, %arg9: memref<8x4xi32, #tpu.memory_space<vmem>>, %arg10: memref<8x4xf32, #tpu.memory_space<vmem>>) attributes {dimension_semantics = [#tpu.dimension_semantics<parallel>], iteration_bounds = array<i64: 2>, scalar_prefetch = 0 : i64, scratch_operands = 0 : i64, tpu.core_type = #tpu.core_type<tc>, window_params = [{transform_indices = @transform_0, window_bounds = array<i64: 8, 128>}, {pipeline_mode = #tpu.pipeline_mode<synchronous>, transform_indices = @transform_1, window_bounds = array<i64: 128, 16>}, {pipeline_mode = #tpu.pipeline_mode<synchronous>, transform_indices = @transform_2, window_bounds = array<i64: 16, 256>}, {pipeline_mode = #tpu.pipeline_mode<synchronous>, transform_indices = @transform_3, window_bounds = array<i64: 1, 256>}, {pipeline_mode = #tpu.pipeline_mode<synchronous>, transform_indices = @transform_4, window_bounds = array<i64: 256, 16>}, {pipeline_mode = #tpu.pipeline_mode<synchronous>, transform_indices = @transform_5, window_bounds = array<i64: 16, 128>}, {pipeline_mode = #tpu.pipeline_mode<synchronous>, transform_indices = @transform_6, window_bounds = array<i64: 1, 128>}, {transform_indices = @transform_7, window_bounds = array<i64: 8, 128>}, {transform_indices = @transform_8, window_bounds = array<i64: 8, 4>}, {transform_indices = @transform_9, window_bounds = array<i64: 8, 4>}]} {
    %c0 = arith.constant 0 : index
    %c0_0 = arith.constant 0 : index
    %0 = vector.load %arg1[%c0, %c0_0] : memref<8x128xf32, #tpu.memory_space<vmem>>, vector<8x128xf32>
    %c0_1 = arith.constant 0 : index
    %c0_2 = arith.constant 0 : index
    %1 = vector.load %arg2[%c0_1, %c0_2] : memref<128x16xf32, #tpu.memory_space<vmem>>, vector<128x16xf32>
    %cst = arith.constant dense<0.000000e+00> : vector<8x16xf32>
    %2 = tpu.matmul %0, %1, %cst {dimension_numbers = #tpu.dot_dimension_numbers<[1], [0], [0], [1], [0, 0, 1, 1], [], []>} : vector<8x128xf32>, vector<128x16xf32>, vector<8x16xf32> -> vector<8x16xf32>
    %c0_3 = arith.constant 0 : index
    %c0_4 = arith.constant 0 : index
    %3 = vector.load %arg3[%c0_3, %c0_4] : memref<16x256xf32, #tpu.memory_space<vmem>>, vector<16x256xf32>
    %cst_5 = arith.constant dense<0.000000e+00> : vector<8x256xf32>
    %4 = tpu.matmul %2, %3, %cst_5 {dimension_numbers = #tpu.dot_dimension_numbers<[1], [0], [0], [1], [0, 0, 1, 1], [], []>} : vector<8x16xf32>, vector<16x256xf32>, vector<8x256xf32> -> vector<8x256xf32>
    %c0_6 = arith.constant 0 : index
    %c0_7 = arith.constant 0 : index
    %5 = vector.load %arg4[%c0_6, %c0_7] : memref<1x256xf32, #tpu.memory_space<vmem>>, vector<1x256xf32>
    %6 = vector.broadcast %5 : vector<1x256xf32> to vector<8x256xf32>
    %7 = arith.addf %4, %6 : vector<8x256xf32>
    %cst_8 = arith.constant 5.000000e-01 : f32
    %8 = vector.broadcast %cst_8 : f32 to vector<8x256xf32>
    %9 = arith.mulf %8, %7 : vector<8x256xf32>
    %cst_9 = arith.constant 4.471500e-02 : f32
    %10 = vector.broadcast %cst_9 : f32 to vector<8x256xf32>
    %11 = arith.mulf %10, %7 : vector<8x256xf32>
    %12 = arith.mulf %11, %7 : vector<8x256xf32>
    %13 = arith.mulf %12, %7 : vector<8x256xf32>
    %14 = arith.addf %7, %13 : vector<8x256xf32>
    %cst_10 = arith.constant 0.797884583 : f32
    %15 = vector.broadcast %cst_10 : f32 to vector<8x256xf32>
    %16 = arith.mulf %15, %14 : vector<8x256xf32>
    %17 = math.tanh %16 : vector<8x256xf32>
    %cst_11 = arith.constant 1.000000e+00 : f32
    %18 = vector.broadcast %cst_11 : f32 to vector<8x256xf32>
    %19 = arith.addf %18, %17 : vector<8x256xf32>
    %20 = arith.mulf %9, %19 : vector<8x256xf32>
    %21 = tpu.iota {dimensions = array<i32: 1>} : vector<8x256xi32>
    %22 = tpu.iota {dimensions = array<i32: 1>} : vector<8x4xi32>
    %c0_i32 = arith.constant 0 : i32
    %23 = vector.broadcast %c0_i32 : i32 to vector<8x4xi32>
    %cst_12 = arith.constant 0.000000e+00 : f32
    %24 = vector.broadcast %cst_12 : f32 to vector<8x4xf32>
    %cst_13 = arith.constant dense<0xFF800000> : vector<8xf32>
    %25 = vector.multi_reduction <maximumf>, %20, %cst_13 [1] : vector<8x256xf32> to vector<8xf32>
    %26 = vector.shape_cast %25 : vector<8xf32> to vector<8x1xf32>
    %27 = vector.broadcast %26 : vector<8x1xf32> to vector<8x256xf32>
    %28 = arith.cmpf oeq, %20, %27 : vector<8x256xf32>
    %c-1_i32 = arith.constant -1 : i32
    %29 = vector.broadcast %c-1_i32 : i32 to vector<8x256xi32>
    %30 = arith.select %28, %21, %29 : vector<8x256xi1>, vector<8x256xi32>
    %cst_14 = arith.constant dense<-2147483648> : vector<8xi32>
    %31 = vector.multi_reduction <maxsi>, %30, %cst_14 [1] : vector<8x256xi32> to vector<8xi32>
    %32 = vector.shape_cast %31 : vector<8xi32> to vector<8x1xi32>
    %33 = vector.broadcast %32 : vector<8x1xi32> to vector<8x256xi32>
    %34 = arith.cmpi eq, %21, %33 : vector<8x256xi32>
    %cst_15 = arith.constant 0xFF800000 : f32
    %35 = vector.broadcast %cst_15 : f32 to vector<8x256xf32>
    %36 = arith.select %34, %35, %20 : vector<8x256xi1>, vector<8x256xf32>
    %c0_i32_16 = arith.constant 0 : i32
    %37 = vector.broadcast %c0_i32_16 : i32 to vector<8x4xi32>
    %38 = arith.cmpi eq, %22, %37 : vector<8x4xi32>
    %39 = vector.shape_cast %32 : vector<8x1xi32> to vector<8x1xi32>
    %40 = vector.broadcast %39 : vector<8x1xi32> to vector<8x4xi32>
    %41 = arith.select %38, %40, %23 : vector<8x4xi1>, vector<8x4xi32>
    %c0_i32_17 = arith.constant 0 : i32
    %42 = vector.broadcast %c0_i32_17 : i32 to vector<8x4xi32>
    %43 = arith.cmpi eq, %22, %42 : vector<8x4xi32>
    %44 = vector.shape_cast %26 : vector<8x1xf32> to vector<8x1xf32>
    %45 = vector.broadcast %44 : vector<8x1xf32> to vector<8x4xf32>
    %46 = arith.select %43, %45, %24 : vector<8x4xi1>, vector<8x4xf32>
    %cst_18 = arith.constant dense<0xFF800000> : vector<8xf32>
    %47 = vector.multi_reduction <maximumf>, %36, %cst_18 [1] : vector<8x256xf32> to vector<8xf32>
    %48 = vector.shape_cast %47 : vector<8xf32> to vector<8x1xf32>
    %49 = vector.broadcast %48 : vector<8x1xf32> to vector<8x256xf32>
    %50 = arith.cmpf oeq, %36, %49 : vector<8x256xf32>
    %c-1_i32_19 = arith.constant -1 : i32
    %51 = vector.broadcast %c-1_i32_19 : i32 to vector<8x256xi32>
    %52 = arith.select %50, %21, %51 : vector<8x256xi1>, vector<8x256xi32>
    %cst_20 = arith.constant dense<-2147483648> : vector<8xi32>
    %53 = vector.multi_reduction <maxsi>, %52, %cst_20 [1] : vector<8x256xi32> to vector<8xi32>
    %54 = vector.shape_cast %53 : vector<8xi32> to vector<8x1xi32>
    %55 = vector.broadcast %54 : vector<8x1xi32> to vector<8x256xi32>
    %56 = arith.cmpi eq, %21, %55 : vector<8x256xi32>
    %cst_21 = arith.constant 0xFF800000 : f32
    %57 = vector.broadcast %cst_21 : f32 to vector<8x256xf32>
    %58 = arith.select %56, %57, %36 : vector<8x256xi1>, vector<8x256xf32>
    %c1_i32 = arith.constant 1 : i32
    %59 = vector.broadcast %c1_i32 : i32 to vector<8x4xi32>
    %60 = arith.cmpi eq, %22, %59 : vector<8x4xi32>
    %61 = vector.shape_cast %54 : vector<8x1xi32> to vector<8x1xi32>
    %62 = vector.broadcast %61 : vector<8x1xi32> to vector<8x4xi32>
    %63 = arith.select %60, %62, %41 : vector<8x4xi1>, vector<8x4xi32>
    %c1_i32_22 = arith.constant 1 : i32
    %64 = vector.broadcast %c1_i32_22 : i32 to vector<8x4xi32>
    %65 = arith.cmpi eq, %22, %64 : vector<8x4xi32>
    %66 = vector.shape_cast %48 : vector<8x1xf32> to vector<8x1xf32>
    %67 = vector.broadcast %66 : vector<8x1xf32> to vector<8x4xf32>
    %68 = arith.select %65, %67, %46 : vector<8x4xi1>, vector<8x4xf32>
    %cst_23 = arith.constant dense<0xFF800000> : vector<8xf32>
    %69 = vector.multi_reduction <maximumf>, %58, %cst_23 [1] : vector<8x256xf32> to vector<8xf32>
    %70 = vector.shape_cast %69 : vector<8xf32> to vector<8x1xf32>
    %71 = vector.broadcast %70 : vector<8x1xf32> to vector<8x256xf32>
    %72 = arith.cmpf oeq, %58, %71 : vector<8x256xf32>
    %c-1_i32_24 = arith.constant -1 : i32
    %73 = vector.broadcast %c-1_i32_24 : i32 to vector<8x256xi32>
    %74 = arith.select %72, %21, %73 : vector<8x256xi1>, vector<8x256xi32>
    %cst_25 = arith.constant dense<-2147483648> : vector<8xi32>
    %75 = vector.multi_reduction <maxsi>, %74, %cst_25 [1] : vector<8x256xi32> to vector<8xi32>
    %76 = vector.shape_cast %75 : vector<8xi32> to vector<8x1xi32>
    %77 = vector.broadcast %76 : vector<8x1xi32> to vector<8x256xi32>
    %78 = arith.cmpi eq, %21, %77 : vector<8x256xi32>
    %cst_26 = arith.constant 0xFF800000 : f32
    %79 = vector.broadcast %cst_26 : f32 to vector<8x256xf32>
    %80 = arith.select %78, %79, %58 : vector<8x256xi1>, vector<8x256xf32>
    %c2_i32 = arith.constant 2 : i32
    %81 = vector.broadcast %c2_i32 : i32 to vector<8x4xi32>
    %82 = arith.cmpi eq, %22, %81 : vector<8x4xi32>
    %83 = vector.shape_cast %76 : vector<8x1xi32> to vector<8x1xi32>
    %84 = vector.broadcast %83 : vector<8x1xi32> to vector<8x4xi32>
    %85 = arith.select %82, %84, %63 : vector<8x4xi1>, vector<8x4xi32>
    %c2_i32_27 = arith.constant 2 : i32
    %86 = vector.broadcast %c2_i32_27 : i32 to vector<8x4xi32>
    %87 = arith.cmpi eq, %22, %86 : vector<8x4xi32>
    %88 = vector.shape_cast %70 : vector<8x1xf32> to vector<8x1xf32>
    %89 = vector.broadcast %88 : vector<8x1xf32> to vector<8x4xf32>
    %90 = arith.select %87, %89, %68 : vector<8x4xi1>, vector<8x4xf32>
    %cst_28 = arith.constant dense<0xFF800000> : vector<8xf32>
    %91 = vector.multi_reduction <maximumf>, %80, %cst_28 [1] : vector<8x256xf32> to vector<8xf32>
    %92 = vector.shape_cast %91 : vector<8xf32> to vector<8x1xf32>
    %93 = vector.broadcast %92 : vector<8x1xf32> to vector<8x256xf32>
    %94 = arith.cmpf oeq, %80, %93 : vector<8x256xf32>
    %c-1_i32_29 = arith.constant -1 : i32
    %95 = vector.broadcast %c-1_i32_29 : i32 to vector<8x256xi32>
    %96 = arith.select %94, %21, %95 : vector<8x256xi1>, vector<8x256xi32>
    %cst_30 = arith.constant dense<-2147483648> : vector<8xi32>
    %97 = vector.multi_reduction <maxsi>, %96, %cst_30 [1] : vector<8x256xi32> to vector<8xi32>
    %98 = vector.shape_cast %97 : vector<8xi32> to vector<8x1xi32>
    %99 = vector.broadcast %98 : vector<8x1xi32> to vector<8x256xi32>
    %100 = arith.cmpi eq, %21, %99 : vector<8x256xi32>
    %cst_31 = arith.constant 0xFF800000 : f32
    %101 = vector.broadcast %cst_31 : f32 to vector<8x256xf32>
    %102 = arith.select %100, %101, %80 : vector<8x256xi1>, vector<8x256xf32>
    %c3_i32 = arith.constant 3 : i32
    %103 = vector.broadcast %c3_i32 : i32 to vector<8x4xi32>
    %104 = arith.cmpi eq, %22, %103 : vector<8x4xi32>
    %105 = vector.shape_cast %98 : vector<8x1xi32> to vector<8x1xi32>
    %106 = vector.broadcast %105 : vector<8x1xi32> to vector<8x4xi32>
    %107 = arith.select %104, %106, %85 : vector<8x4xi1>, vector<8x4xi32>
    %c3_i32_32 = arith.constant 3 : i32
    %108 = vector.broadcast %c3_i32_32 : i32 to vector<8x4xi32>
    %109 = arith.cmpi eq, %22, %108 : vector<8x4xi32>
    %110 = vector.shape_cast %92 : vector<8x1xf32> to vector<8x1xf32>
    %111 = vector.broadcast %110 : vector<8x1xf32> to vector<8x4xf32>
    %112 = arith.select %109, %111, %90 : vector<8x4xi1>, vector<8x4xf32>
    %cst_33 = arith.constant 0xFF800000 : f32
    %113 = vector.broadcast %cst_33 : f32 to vector<8x256xf32>
    %114 = arith.cmpf oeq, %102, %113 : vector<8x256xf32>
    %cst_34 = arith.constant 0.000000e+00 : f32
    %115 = vector.broadcast %cst_34 : f32 to vector<8x256xf32>
    %116 = arith.select %114, %20, %115 : vector<8x256xi1>, vector<8x256xf32>
    %c0_35 = arith.constant 0 : index
    %c0_36 = arith.constant 0 : index
    %117 = vector.load %arg5[%c0_35, %c0_36] : memref<256x16xf32, #tpu.memory_space<vmem>>, vector<256x16xf32>
    %cst_37 = arith.constant dense<0.000000e+00> : vector<8x16xf32>
    %118 = tpu.matmul %116, %117, %cst_37 {dimension_numbers = #tpu.dot_dimension_numbers<[1], [0], [0], [1], [0, 0, 1, 1], [], []>} : vector<8x256xf32>, vector<256x16xf32>, vector<8x16xf32> -> vector<8x16xf32>
    %c0_38 = arith.constant 0 : index
    %c0_39 = arith.constant 0 : index
    %119 = vector.load %arg6[%c0_38, %c0_39] : memref<16x128xf32, #tpu.memory_space<vmem>>, vector<16x128xf32>
    %cst_40 = arith.constant dense<0.000000e+00> : vector<8x128xf32>
    %120 = tpu.matmul %118, %119, %cst_40 {dimension_numbers = #tpu.dot_dimension_numbers<[1], [0], [0], [1], [0, 0, 1, 1], [], []>} : vector<8x16xf32>, vector<16x128xf32>, vector<8x128xf32> -> vector<8x128xf32>
    %c0_41 = arith.constant 0 : index
    %c0_42 = arith.constant 0 : index
    %121 = vector.load %arg7[%c0_41, %c0_42] : memref<1x128xf32, #tpu.memory_space<vmem>>, vector<1x128xf32>
    %122 = vector.broadcast %121 : vector<1x128xf32> to vector<8x128xf32>
    %123 = arith.addf %120, %122 : vector<8x128xf32>
    %c0_43 = arith.constant 0 : index
    %c0_44 = arith.constant 0 : index
    %124 = vector.load %arg8[%c0_43, %c0_44] : memref<8x128xf32, #tpu.memory_space<vmem>>, vector<8x128xf32>
    tpu.vector_store %arg8[%c0_43, %c0_44], %123 {strides = array<i32>} : memref<8x128xf32, #tpu.memory_space<vmem>>, vector<8x128xf32>,
    %c0_45 = arith.constant 0 : index
    %c0_46 = arith.constant 0 : index
    %125 = vector.load %arg9[%c0_45, %c0_46] : memref<8x4xi32, #tpu.memory_space<vmem>>, vector<8x4xi32>
    tpu.vector_store %arg9[%c0_45, %c0_46], %107 {strides = array<i32>} : memref<8x4xi32, #tpu.memory_space<vmem>>, vector<8x4xi32>,
    %c0_47 = arith.constant 0 : index
    %c0_48 = arith.constant 0 : index
    %126 = vector.load %arg10[%c0_47, %c0_48] : memref<8x4xf32, #tpu.memory_space<vmem>>, vector<8x4xf32>
    tpu.vector_store %arg10[%c0_47, %c0_48], %112 {strides = array<i32>} : memref<8x4xf32, #tpu.memory_space<vmem>>, vector<8x4xf32>,
    return
  }
  func.func @transform_0(%arg0: i32) -> (i32, i32) {
    %c0_i32 = arith.constant 0 : i32
    %c0_i32_0 = arith.constant 0 : i32
    return %arg0, %c0_i32 : i32, i32
  }
  func.func @transform_1(%arg0: i32) -> (i32, i32) {
    %c0_i32 = arith.constant 0 : i32
    %c0_i32_0 = arith.constant 0 : i32
    %c0_i32_1 = arith.constant 0 : i32
    return %c0_i32, %c0_i32_0 : i32, i32
  }
  func.func @transform_2(%arg0: i32) -> (i32, i32) {
    %c0_i32 = arith.constant 0 : i32
    %c0_i32_0 = arith.constant 0 : i32
    %c0_i32_1 = arith.constant 0 : i32
    return %c0_i32, %c0_i32_0 : i32, i32
  }
  func.func @transform_3(%arg0: i32) -> (i32, i32) {
    %c0_i32 = arith.constant 0 : i32
    %c0_i32_0 = arith.constant 0 : i32
    %c0_i32_1 = arith.constant 0 : i32
    return %c0_i32, %c0_i32_0 : i32, i32
  }
  func.func @transform_4(%arg0: i32) -> (i32, i32) {
    %c0_i32 = arith.constant 0 : i32
    %c0_i32_0 = arith.constant 0 : i32
    %c0_i32_1 = arith.constant 0 : i32
    return %c0_i32, %c0_i32_0 : i32, i32
  }
  func.func @transform_5(%arg0: i32) -> (i32, i32) {
    %c0_i32 = arith.constant 0 : i32
    %c0_i32_0 = arith.constant 0 : i32
    %c0_i32_1 = arith.constant 0 : i32
    return %c0_i32, %c0_i32_0 : i32, i32
  }
  func.func @transform_6(%arg0: i32) -> (i32, i32) {
    %c0_i32 = arith.constant 0 : i32
    %c0_i32_0 = arith.constant 0 : i32
    %c0_i32_1 = arith.constant 0 : i32
    return %c0_i32, %c0_i32_0 : i32, i32
  }
  func.func @transform_7(%arg0: i32) -> (i32, i32) {
    %c0_i32 = arith.constant 0 : i32
    %c0_i32_0 = arith.constant 0 : i32
    return %arg0, %c0_i32 : i32, i32
  }
  func.func @transform_8(%arg0: i32) -> (i32, i32) {
    %c0_i32 = arith.constant 0 : i32
    %c0_i32_0 = arith.constant 0 : i32
    return %arg0, %c0_i32 : i32, i32
  }
  func.func @transform_9(%arg0: i32) -> (i32, i32) {
    %c0_i32 = arith.constant 0 : i32
    %c0_i32_0 = arith.constant 0 : i32
    return %arg0, %c0_i32 : i32, i32
  }
}

</mosaic_0001>

<bundles_post_ra>
// kernel: tpu_custom_call.1
= control target key start
LH: loop header
LB: loop body
LE: loop exit
PB: predicated region body
PF: predicated region fallthrough
CT: control target
= control target key end

     0   :  { %15 = vsyncpa [#allocation3], 0  ;;  %s1640_s0 = inlined_call_operand.vmem [shape: f32[16,128], index: 0, kind: input, shape index: {}]   ;;  %s1641_s1 = inlined_call_operand.vmem [shape: f32[128,16], index: 1, kind: input, shape index: {}]   ;;  %s1642_s2 = inlined_call_operand.vmem [shape: f32[16,256], index: 2, kind: input, shape index: {}]   ;;  %s1643_s3 = inlined_call_operand.vmem [shape: f32[1,256], index: 3, kind: input, shape index: {}]   ;;  %s1644_s4 = inlined_call_operand.vmem [shape: f32[256,16], index: 4, kind: input, shape index: {}]   ;;  %s1645_s5 = inlined_call_operand.vmem [shape: f32[16,128], index: 5, kind: input, shape index: {}]   ;;  %s1646_s6 = inlined_call_operand.vmem [shape: f32[1,128], index: 6, kind: input, shape index: {}]   ;;  %s1647_s7 = inlined_call_operand.hbm [shape: f32[16,128], index: 7, kind: output, shape index: {0}]   ;;  %s1648_s8 = inlined_call_operand.vmem [shape: s32[16,4], index: 8, kind: output, shape index: {1}]   ;;  %s1649_s9 = inlined_call_operand.vmem [shape: f32[16,4], index: 9, kind: output, shape index: {2}]  }
   0x1   :  { %17 = vsyncpa [#allocation3 + $0x1], 0  ;;  %s1269_s30 = smov 0   ;;  %s1271_s10 = smov 0  }
   0x2   :  { %s1273_s11 = smov 0   ;;  %s1275_s12 = smov 0  }
   0x3 LB: > { %s1290_s13 = sadd.s32 4294967295, %s1214_s12   ;;  %s995_s14 = sadd.s32 4294967294, %s1214_s12   ;;  %s1214_s12 = sphi %s1275_s12, %s1655_s12   ;;  %s1210_s11 = sphi %s1273_s11, %s1654_s11   ;;  %s1206_s10 = sphi %s1271_s10, %s1653_s10   ;;  %s1202_s30 = sphi %s1269_s30, %s1652_s30  }
   0x4   : > { %s1294_s15 = sadd.s32 1, %s1214_s12   ;;  %s182_s16 = sadd.s32 1, %s1210_s11 }
   0x5   : > { %s179_s17 = ssub.s32 %s1214_s12, %s1294_s15  ;;  %p192_p0 = scmp.ne.s32.totalorder %s1210_s11, %s1206_s10 }
   0x6   : > { %p180_p1 = scmp.eq.s32.totalorder %s179_s17, 0  ;;  %p193_p2 = scmp.eq.s32.totalorder %s1290_s13, 1 }
   0x7   : > { %p198_p3 = scmp.ne.s32.totalorder %s1206_s10, %s1202_s30  ;;  %p199_p4 = scmp.eq.s32.totalorder %s995_s14, 1 }
   0x8   : > { %s1305_s18 = scalar_select %p180_p1, %s1210_s11, %s182_s16  }
   0x9   : > { %p1307_p5 = por %p193_p2, %p192_p0  ;;  %p1311_p6 = por %p199_p4, %p198_p3 }
   0xa   : > { %p998_p7 = scmp.ge.s32.totalorder %s1214_s12, 1  ;;  %p294_p8 = scmp.lt.s32.totalorder %s1214_s12, 3 }
   0xc   : > { %p295_p9 = pnand %p998_p7, %p294_p8 }
   0xd   : > { %p337_p10 = scmp.lt.s32.totalorder (!%p295_p9), %s1290_s13, 1  ;;  %s322_s28 = sand.u32 (!%p295_p9), 1, %s1206_s10  }
   0xe   : > { %298 = sbr.rel (%p295_p9) target bundleno = 2605 (0xa2d), region = 48  ;;  %s999_s29 = sshll.u32 (!%p295_p9), %s322_s28, 3 }
   0xf   : > { %s1009_s21 = sshll.u32 (!%p295_p9), %s1290_s13, 7  ;;  %s324_s22 = scalar_lea.vmem (!%p295_p9), [#allocation2], %s999_s29 }
  0x10   : > { %s1218_s16 = smov (!%p295_p9), [#allocation2]  }
  0x13   : > { %v365_v0 = vld [vmem:[%s1641_s1 + $0x78] sm:$0xff]  ;;  %v1216_v1 = vmov 0.0   ;;  %v364_v2 = vld [vmem:[%s1641_s1 + $0x70] sm:$0xff]  ;;  %vm1217_vm0 = vmmov 0   ;;  %v363_v3 = vld [vmem:[%s1641_s1 + $0x68] sm:$0xff]  ;;  %s338_s25 = scalar_select %p337_p10, %s1290_s13, 1  ;;  %v442_v24 = vlaneseq }
  0x14   : > { %1067 = vmatprep.subr.mxu0 %v1216_v1  ;;  %1099 = vmatprep.mubr.msk.f32.mxu0 %vm1217_vm0, %v1216_v1  ;;  %v362_v4 = vld [vmem:[%s1641_s1 + $0x60] sm:$0xff]  ;;  %v439_v5 = vld [vmem:[%s1642_s2 + $0x18] sm:$0xff]  ;;  %v438_v6 = vld [vmem:[%s1642_s2 + $0x10] sm:$0xff]  ;;  %vm452_vm1 = vcmask 130048   ;;  %s1158_s13 = sshll.u32 %s1218_s16, 4  ;;  %s1159_s13 = int_to_ptr.vmem [resolvable:$false] %s1158_s13 }
  0x15   : > { %1068 = vmatpush3.msra.mxu0 %v365_v0  ;;  %520 = vmatprep.mubr.f32.mxu1 %v1216_v1  ;;  %v437_v7 = vld [vmem:[%s1642_s2 + $0x8] sm:$0xff]  ;;  %v361_v8 = vld [vmem:[%s1641_s1 + $0x58] sm:$0xff]  ;;  %v360_v9 = vld [vmem:[%s1641_s1 + $0x50] sm:$0xff]  ;;  %s1382_s14 = sshll.u32 %s338_s25, 3  ;;  %v443_v25 = vshrl.u32 %v442_v24, 7  ;;  %v1417_v54 = vand.u32 127, %v442_v24 }
  0x16   : > { %1069 = vmatprep.subr.mxu0 %v1216_v1  ;;  %484 = vmatprep.subr.mxu1 %v439_v5  ;;  %v359_v10 = vld [vmem:[%s1641_s1 + $0x48] sm:$0xff]  ;;  %v358_v11 = vld [vmem:[%s1641_s1 + $0x40] sm:$0xff]  ;;  %v357_v12 = vld [vmem:[%s1641_s1 + $0x38] sm:$0xff]  ;;  %s340_s26 = scalar_lea.vmem %s1640_s0, %s1382_s14  ;;  %s348_s23 = scalar_lea.vmem %s1649_s9, %s1382_s14 }
  0x17   : > { %1070 = vmatpush3.msra.mxu0 %v364_v2  ;;  %485 = vmatpush1.msra.mxu1 %v438_v6  ;;  %v356_v13 = vld [vmem:[%s1641_s1 + $0x30] sm:$0xff]  ;;  %v355_v14 = vld [vmem:[%s1641_s1 + $0x28] sm:$0xff]  ;;  %v354_v15 = vld [vmem:[%s1641_s1 + $0x20] sm:$0xff]  ;;  %v444_v26 = vsub.s32 0, %v443_v25  ;;  %v448_v28 = vsub.s32 1, %v443_v25  ;;  %v1420_v55 = vadd.s32 128, %v1417_v54  ;;  %s344_s24 = scalar_lea.vmem %s1648_s8, %s1382_s14 }
  0x18   : > { %1071 = vmatprep.subr.mxu0 %v1216_v1  ;;  %486 = vmatprep.subr.mxu1 %v437_v7  ;;  %v353_v16 = vld [vmem:[%s1641_s1 + $0x18] sm:$0xff]  ;;  %v352_v17 = vld [vmem:[%s1641_s1 + $0x10] sm:$0xff]  ;;  %v351_v18 = vld [vmem:[%s1641_s1 + $0x8] sm:$0xff]  ;;  %vm575_vm12 = vcmp.eq.s32.totalorder %v1417_v54, 0  ;;  %vm605_vm13 = vcmp.eq.s32.totalorder %v1417_v54, 1  ;;  %s861_s25 = scalar_lea.sflag [#allocation3], %s322_s28 }
  0x19   : > { %1072 = vmatpush3.msra.mxu0 %v363_v3  ;;  %v350_v19 = vld [vmem:[%s1641_s1] sm:$0xff]  ;;  %s1160_s29 = scalar_lea.vmem %s1159_s13, 256 }
  0x1a   : > { %1073 = vmatprep.subr.mxu0 %v1216_v1  ;;  %v349_v20 = vld [vmem:[%s340_s26] sm:$0xff]  ;;  %s1605_s26 = scalar_lea.hbm %s1647_s7, %s1009_s21 }
  0x1b   : > { %1074 = vmatpush3.msra.mxu0 %v362_v4  ;;  %v436_v21 = vld [vmem:[%s1642_s2] sm:$0xff] }
  0x1c   : > { %1075 = vmatprep.subr.mxu0 %v1216_v1  ;;  %487 = vmatpush1.msra.mxu1 %v436_v21  ;;  %v440_v27 = vld [vmem:[%s1643_s3] sm:$0x3] }
  0x1d   : > { %1076 = vmatpush3.msra.mxu0 %v361_v8  ;;  %v445_v29 = vrot.slane %v440_v27, %v444_v26  ;;  %v449_v30 = vrot.slane %v440_v27, %v448_v28 }
  0x1e   : > { %1077 = vmatprep.subr.mxu0 %v1216_v1 }
  0x1f   : > { %1078 = vmatpush3.msra.mxu0 %v360_v9 }
  0x20   : > { %1079 = vmatprep.subr.mxu0 %v1216_v1 }
  0x21   : > { %1080 = vmatpush3.msra.mxu0 %v359_v10 }
  0x22   : > { %1081 = vmatprep.subr.mxu0 %v1216_v1 }
  0x23   : > { %1082 = vmatpush3.msra.mxu0 %v358_v11 }
  0x24   : > { %1083 = vmatprep.subr.mxu0 %v1216_v1 }
  0x25   : > { %1084 = vmatpush3.msra.mxu0 %v357_v12 }
  0x26   : > { %1085 = vmatprep.subr.mxu0 %v1216_v1 }
  0x27   : > { %1086 = vmatpush3.msra.mxu0 %v356_v13 }
  0x28   : > { %1087 = vmatprep.subr.mxu0 %v1216_v1 }
  0x29   : > { %1088 = vmatpush3.msra.mxu0 %v355_v14 }
  0x2a   : > { %1089 = vmatprep.subr.mxu0 %v1216_v1 }
  0x2b   : > { %1090 = vmatpush3.msra.mxu0 %v354_v15 }
  0x2c   : > { %1091 = vmatprep.subr.mxu0 %v1216_v1 }
  0x2d   : > { %1092 = vmatpush3.msra.mxu0 %v353_v16 }
  0x2e   : > { %1093 = vmatprep.subr.mxu0 %v1216_v1 }
  0x2f   : > { %1094 = vmatpush3.msra.mxu0 %v352_v17 }
  0x30   : > { %1095 = vmatprep.subr.mxu0 %v1216_v1 }
  0x31   : > { %1096 = vmatpush3.msra.mxu0 %v351_v18 }
  0x32   : > { %1097 = vmatprep.subr.mxu0 %v1216_v1 }
  0x33   : > { %1098 = vmatpush3.msra.mxu0 %v350_v19 }
  0x34   : > { %1100 = vmatmul.mubr.f32.vlgmr.msra.gmra.mxu0 %v349_v20  ;;  %1102 = vmatprep.subr.mxu0 %v1216_v1 }
  0x35   : > { %1106 = vmatprep.mubr.msk.f32.mxu0 %vm1217_vm0, %v1216_v1 }
  0xf4   : > { %v432_v22 = vpop.f32.mrf.mxu0 }
  0xf5   : > { %1003 = vmatmul.mubr.msk.f32.vlgmr.msra.gmra.mxu1 %vm452_vm1, %v432_v22 }
  0xf6   : > { %v1101_v23 = vpop.f32.mrf.mxu0 }
 0x1b5   : > { %v522_v31 = vpop.f32.mrf.mxu1 }
 0x1b6   : > { %v523_v32 = vadd.f32 %v522_v31, %v445_v29 }
 0x1b7   : > { %v524_v33 = vpop.f32.mrf.mxu1 }
 0x1b8   : > { %v529_v34 = vmul.f32 0.044715, %v523_v32  ;;  %v525_v35 = vadd.f32 %v524_v33, %v449_v30  ;;  %v527_v48 = vmul.f32 0.5, %v523_v32 }
 0x1ba   : > { %v531_v36 = vmul.f32 %v529_v34, %v523_v32  ;;  %v530_v37 = vmul.f32 0.044715, %v525_v35  ;;  %v528_v49 = vmul.f32 0.5, %v525_v35 }
 0x1bc   : > { %v533_v38 = vmul.f32 %v531_v36, %v523_v32  ;;  %v532_v39 = vmul.f32 %v530_v37, %v525_v35 }
 0x1be   : > { %v535_v40 = vadd.f32 %v533_v38, %v523_v32  ;;  %v534_v41 = vmul.f32 %v532_v39, %v525_v35 }
 0x1c0   : > { %v537_v42 = vmul.f32 0.7978846, %v535_v40  ;;  %v536_v43 = vadd.f32 %v534_v41, %v525_v35 }
 0x1c2   : > { %v538_v44 = vmul.f32 0.7978846, %v536_v43  ;;  %1150 = vtanh.f32 %v537_v42 }
 0x1c4   : > { %1152 = vtanh.f32 %v538_v44 }
 0x1cf   : > { %v1151_v45 = vpop.eup %1150 }
 0x1d0   : > { %v541_v46 = vadd.f32 1.0, %v1151_v45 }
 0x1d1   : > { %v1153_v47 = vpop.eup %1152 }
 0x1d2   : > { %v542_v50 = vadd.f32 1.0, %v1153_v47  ;;  %v1411_v51 = vmul.f32 %v541_v46, %v527_v48 }
 0x1d4   : > { %v1413_v52 = vmul.f32 %v542_v50, %v528_v49 }
 0x1d6   : > { %v548_v53 = vmax.f32 %v1411_v51, %v1413_v52 }
 0x1d8   : > { %549 = vmax.xlane.f32.xlu0 %v548_v53 }
 0x261   : > { %v1422_v56 = vpop.xlane.xlu0 %549 }
 0x262   : > { %vm551_vm2 = vcmp.eq.f32.partialorder %v1411_v51, %v1422_v56  ;;  %vm552_vm3 = vcmp.eq.f32.partialorder %v1413_v52, %v1422_v56  ;;  %v577_v50 = vsel %vm575_vm12, %v1422_v56, 0.0 }
 0x263   : > { %v553_v57 = vsel %vm551_vm2, %v1417_v54, 4294967295  ;;  %v554_v58 = vsel %vm552_vm3, %v1420_v55, 4294967295 }
 0x264   : > { %vm555_vm4 = vcmp.gt.s32.totalorder %v553_v57, %v554_v58 }
 0x265   : > { %v556_v59 = vsel %vm555_vm4, %v553_v57, %v554_v58 }
 0x266   : > { %v558_v60 = vshra.s32 %v556_v59, 16  ;;  %v557_v62 = vand.u32 65535, %v556_v59 }
 0x268   : > { %v560_v61 = vcvt.s32.f32 %v558_v60  ;;  %v559_v0 = vcvt.s32.f32 %v557_v62 }
 0x26a   : > { %561 = vmax.xlane.f32.xlu0 %v560_v61 }
 0x2f3   : > { %v562_v63 = vpop.xlane.xlu0 %561 }
 0x2f4   : > { %vm563_vm5 = vcmp.eq.f32.partialorder %v560_v61, %v562_v63  ;;  %v568_v3 = vcvt.f32.s32 %v562_v63 }
 0x2f5   : > { %v564_v2 = vsel %vm563_vm5, %v559_v0, -inf  ;;  %vm635_vm5 = vcmp.eq.s32.totalorder %v1417_v54, 2  ;;  %v703_v0 = vld [vmem:[%s1644_s4 + $0xf8] sm:$0xff] }
 0x2f6   : > { %565 = vmax.xlane.f32.xlu1 %v564_v2  ;;  %v569_v5 = vshll.u32 %v568_v3, 16  ;;  %v687_v2 = vld [vmem:[%s1644_s4 + $0x78] sm:$0xff]  ;;  %v702_v3 = vld [vmem:[%s1644_s4 + $0xf0] sm:$0xff]  ;;  %1029 = vmatprep.subr.mxu1 %v703_v0 }
 0x2f7   : > { %1030 = vmatpush3.msra.mxu1 %v687_v2 }
 0x2f8   : > { %1031 = vmatprep.subr.mxu1 %v702_v3 }
 0x37f   : > { %v566_v4 = vpop.xlane.xlu1 %565 }
 0x380   : > { %v567_v6 = vcvt.f32.s32 %v566_v4  ;;  %v686_v4 = vld [vmem:[%s1644_s4 + $0x70] sm:$0xff] }
 0x381   : > { %1032 = vmatpush3.msra.mxu1 %v686_v4 }
 0x382   : > { %v570_v7 = vadd.s32 %v569_v5, %v567_v6  ;;  %v701_v5 = vld [vmem:[%s1644_s4 + $0xe8] sm:$0xff] }
 0x383   : > { %v685_v6 = vld [vmem:[%s1644_s4 + $0x68] sm:$0xff]  ;;  %1033 = vmatprep.subr.mxu1 %v701_v5 }
 0x384   : > { %vm571_vm6 = vcmp.eq.s32.totalorder %v1417_v54, %v570_v7  ;;  %vm572_vm7 = vcmp.eq.s32.totalorder %v1420_v55, %v570_v7  ;;  %v576_v26 = vsel %vm575_vm12, %v570_v7, 0  ;;  %v700_v7 = vld [vmem:[%s1644_s4 + $0xe0] sm:$0xff]  ;;  %1034 = vmatpush3.msra.mxu1 %v685_v6 }
 0x385   : > { %v573_v8 = vsel %vm571_vm6, -inf, %v1411_v51  ;;  %v574_v9 = vsel %vm572_vm7, -inf, %v1413_v52  ;;  %1035 = vmatprep.subr.mxu1 %v700_v7 }
 0x386   : > { %v578_v10 = vmax.f32 %v573_v8, %v574_v9 }
 0x388   : > { %579 = vmax.xlane.f32.xlu1 %v578_v10  ;;  %v683_v10 = vld [vmem:[%s1644_s4 + $0x58] sm:$0xff] }
 0x411   : > { %v1434_v11 = vpop.xlane.xlu1 %579 }
 0x412   : > { %vm581_vm8 = vcmp.eq.f32.partialorder %v573_v8, %v1434_v11  ;;  %vm582_vm9 = vcmp.eq.f32.partialorder %v574_v9, %v1434_v11  ;;  %v607_v53 = vsel %vm605_vm13, %v1434_v11, %v577_v50  ;;  %v698_v11 = vld [vmem:[%s1644_s4 + $0xd0] sm:$0xff] }
 0x413   : > { %v583_v12 = vsel %vm581_vm8, %v1417_v54, 4294967295  ;;  %v584_v13 = vsel %vm582_vm9, %v1420_v55, 4294967295  ;;  %vm665_vm8 = vcmp.eq.s32.totalorder %v1417_v54, 3  ;;  %vm857_vm9 = vcmask 31744  }
 0x414   : > { %vm585_vm10 = vcmp.gt.s32.totalorder %v583_v12, %v584_v13 }
 0x415   : > { %v586_v14 = vsel %vm585_vm10, %v583_v12, %v584_v13  ;;  %v682_v12 = vld [vmem:[%s1644_s4 + $0x50] sm:$0xff]  ;;  %v697_v13 = vld [vmem:[%s1644_s4 + $0xc8] sm:$0xff] }
 0x416   : > { %v588_v15 = vshra.s32 %v586_v14, 16  ;;  %v587_v17 = vand.u32 65535, %v586_v14  ;;  %v681_v14 = vld [vmem:[%s1644_s4 + $0x48] sm:$0xff] }
 0x418   : > { %v590_v16 = vcvt.s32.f32 %v588_v15  ;;  %v589_v19 = vcvt.s32.f32 %v587_v17  ;;  %v696_v15 = vld [vmem:[%s1644_s4 + $0xc0] sm:$0xff]  ;;  %v695_v17 = vld [vmem:[%s1644_s4 + $0xb8] sm:$0xff] }
 0x41a   : > { %591 = vmax.xlane.f32.xlu0 %v590_v16 }
 0x4a3   : > { %v592_v18 = vpop.xlane.xlu0 %591 }
 0x4a4   : > { %vm593_vm11 = vcmp.eq.f32.partialorder %v590_v16, %v592_v18  ;;  %v598_v21 = vcvt.f32.s32 %v592_v18  ;;  %v680_v16 = vld [vmem:[%s1644_s4 + $0x40] sm:$0xff]  ;;  %v679_v18 = vld [vmem:[%s1644_s4 + $0x38] sm:$0xff] }
 0x4a5   : > { %v594_v20 = vsel %vm593_vm11, %v589_v19, -inf  ;;  %v694_v19 = vld [vmem:[%s1644_s4 + $0xb0] sm:$0xff] }
 0x4a6   : > { %595 = vmax.xlane.f32.xlu1 %v594_v20  ;;  %v599_v23 = vshll.u32 %v598_v21, 16  ;;  %v678_v20 = vld [vmem:[%s1644_s4 + $0x30] sm:$0xff]  ;;  %v693_v21 = vld [vmem:[%s1644_s4 + $0xa8] sm:$0xff] }
 0x52f   : > { %v596_v22 = vpop.xlane.xlu1 %595 }
 0x530   : > { %v597_v24 = vcvt.f32.s32 %v596_v22  ;;  %v677_v22 = vld [vmem:[%s1644_s4 + $0x28] sm:$0xff] }
 0x532   : > { %v600_v25 = vadd.s32 %v599_v23, %v597_v24  ;;  %v692_v23 = vld [vmem:[%s1644_s4 + $0xa0] sm:$0xff] }
 0x533   : > { %v676_v24 = vld [vmem:[%s1644_s4 + $0x20] sm:$0xff] }
 0x534   : > { %v606_v27 = vsel %vm605_vm13, %v600_v25, %v576_v26  ;;  %vm601_vm14 = vcmp.eq.s32.totalorder %v1417_v54, %v600_v25  ;;  %vm602_vm15 = vcmp.eq.s32.totalorder %v1420_v55, %v600_v25 }
 0x535   : > { %v603_v28 = vsel %vm601_vm14, -inf, %v573_v8  ;;  %v604_v29 = vsel %vm602_vm15, -inf, %v574_v9  ;;  %v684_v8 = vld [vmem:[%s1644_s4 + $0x60] sm:$0xff]  ;;  %v699_v9 = vld [vmem:[%s1644_s4 + $0xd8] sm:$0xff] }
 0x536   : > { %v608_v30 = vmax.f32 %v603_v28, %v604_v29  ;;  %1036 = vmatpush3.msra.mxu1 %v684_v8 }
 0x537   : > { %1037 = vmatprep.subr.mxu1 %v699_v9 }
 0x538   : > { %609 = vmax.xlane.f32.xlu0 %v608_v30  ;;  %1038 = vmatpush3.msra.mxu1 %v683_v10  ;;  %v675_v30 = vld [vmem:[%s1644_s4 + $0x18] sm:$0xff] }
 0x539   : > { %1039 = vmatprep.subr.mxu1 %v698_v11 }
 0x53a   : > { %1040 = vmatpush3.msra.mxu1 %v682_v12 }
 0x53b   : > { %1041 = vmatprep.subr.mxu1 %v697_v13 }
 0x53c   : > { %1042 = vmatpush3.msra.mxu1 %v681_v14 }
 0x53d   : > { %1043 = vmatprep.subr.mxu1 %v696_v15 }
 0x53e   : > { %1044 = vmatpush3.msra.mxu1 %v680_v16 }
 0x53f   : > { %1045 = vmatprep.subr.mxu1 %v695_v17 }
 0x540   : > { %1046 = vmatpush3.msra.mxu1 %v679_v18 }
 0x541   : > { %1047 = vmatprep.subr.mxu1 %v694_v19 }
 0x542   : > { %1048 = vmatpush3.msra.mxu1 %v678_v20 }
 0x543   : > { %1049 = vmatprep.subr.mxu1 %v693_v21 }
 0x544   : > { %1050 = vmatpush3.msra.mxu1 %v677_v22 }
 0x545   : > { %1051 = vmatprep.subr.mxu1 %v692_v23 }
 0x546   : > { %1052 = vmatpush3.msra.mxu1 %v676_v24 }
 0x5c1   : > { %v610_v31 = vpop.xlane.xlu0 %609 }
 0x5c2   : > { %vm611_vm0 = vcmp.eq.f32.partialorder %v603_v28, %v610_v31  ;;  %vm612_vm2 = vcmp.eq.f32.partialorder %v604_v29, %v610_v31  ;;  %v637_v57 = vsel %vm635_vm5, %v610_v31, %v607_v53  ;;  %v690_v31 = vld [vmem:[%s1644_s4 + $0x90] sm:$0xff] }
 0x5c3   : > { %v613_v32 = vsel %vm611_vm0, %v1417_v54, 4294967295  ;;  %v614_v33 = vsel %vm612_vm2, %v1420_v55, 4294967295 }
 0x5c4   : > { %vm615_vm3 = vcmp.gt.s32.totalorder %v613_v32, %v614_v33 }
 0x5c5   : > { %v616_v34 = vsel %vm615_vm3, %v613_v32, %v614_v33  ;;  %v674_v32 = vld [vmem:[%s1644_s4 + $0x10] sm:$0xff]  ;;  %v689_v33 = vld [vmem:[%s1644_s4 + $0x88] sm:$0xff] }
 0x5c6   : > { %v618_v35 = vshra.s32 %v616_v34, 16  ;;  %v617_v37 = vand.u32 65535, %v616_v34  ;;  %v673_v34 = vld [vmem:[%s1644_s4 + $0x8] sm:$0xff] }
 0x5c8   : > { %v620_v36 = vcvt.s32.f32 %v618_v35  ;;  %v619_v39 = vcvt.s32.f32 %v617_v37  ;;  %v688_v35 = vld [vmem:[%s1644_s4 + $0x80] sm:$0xff] }
 0x5ca   : > { %621 = vmax.xlane.f32.xlu1 %v620_v36 }
 0x653   : > { %v622_v38 = vpop.xlane.xlu1 %621 }
 0x654   : > { %vm623_vm4 = vcmp.eq.f32.partialorder %v620_v36, %v622_v38  ;;  %v628_v41 = vcvt.f32.s32 %v622_v38  ;;  %v672_v36 = vld [vmem:[%s1644_s4] sm:$0xff] }
 0x655   : > { %v624_v40 = vsel %vm623_vm4, %v619_v39, -inf }
 0x656   : > { %625 = vmax.xlane.f32.xlu0 %v624_v40  ;;  %v629_v43 = vshll.u32 %v628_v41, 16 }
 0x6df   : > { %v626_v42 = vpop.xlane.xlu0 %625 }
 0x6e0   : > { %v627_v44 = vcvt.f32.s32 %v626_v42 }
 0x6e2   : > { %v630_v45 = vadd.s32 %v629_v43, %v627_v44 }
 0x6e4   : > { %v1451_v46 = vsel %vm635_vm5, %v630_v45, %v606_v27  ;;  %vm631_vm6 = vcmp.eq.s32.totalorder %v1417_v54, %v630_v45  ;;  %vm632_vm7 = vcmp.eq.s32.totalorder %v1420_v55, %v630_v45 }
 0x6e5   : > { %v1455_v47 = vsel %vm631_vm6, -inf, %v603_v28  ;;  %v1457_v48 = vsel %vm632_vm7, -inf, %v604_v29  ;;  %v691_v29 = vld [vmem:[%s1644_s4 + $0x98] sm:$0xff] }
 0x6e6   : > { %v638_v49 = vmax.f32 %v1455_v47, %v1457_v48  ;;  %1053 = vmatprep.subr.mxu1 %v691_v29 }
 0x6e7   : > { %1054 = vmatpush3.msra.mxu1 %v675_v30 }
 0x6e8   : > { %639 = vmax.xlane.f32.xlu1 %v638_v49  ;;  %1055 = vmatprep.subr.mxu1 %v690_v31 }
 0x6e9   : > { %1056 = vmatpush3.msra.mxu1 %v674_v32 }
 0x6ea   : > { %1057 = vmatprep.subr.mxu1 %v689_v33 }
 0x6eb   : > { %1058 = vmatpush3.msra.mxu1 %v673_v34 }
 0x6ec   : > { %1059 = vmatprep.subr.mxu1 %v688_v35 }
 0x6ed   : > { %1060 = vmatpush3.msra.mxu1 %v672_v36 }
 0x771   : > { %v640_v58 = vpop.xlane.xlu1 %639 }
 0x772   : > { %vm641_vm10 = vcmp.eq.f32.partialorder %v1455_v47, %v640_v58  ;;  %vm642_vm11 = vcmp.eq.f32.partialorder %v1457_v48, %v640_v58  ;;  %v667_v56 = vsel %vm665_vm8, %v640_v58, %v637_v57 }
 0x773   : > { %v643_v59 = vsel %vm641_vm10, %v1417_v54, 4294967295  ;;  %v644_v60 = vsel %vm642_vm11, %v1420_v55, 4294967295  ;;  %859 = vst.msk [vmem:[%s348_s23] sm:$0xff] %vm857_vm9, %v667_v56  ;;  %s882_s23 = sshll.u32 %s324_s22, 4  ;;  %s883_s23 = int_to_ptr.vmem [resolvable:$true] %s882_s23 }
 0x774   : > { %vm645_vm12 = vcmp.gt.s32.totalorder %v643_v59, %v644_v60  ;;  %s1154_s27 = scalar_lea.vmem %s883_s23, 128  ;;  %p1161_p0 = scmp.lt.s32.totalorder %s883_s23, %s1159_s13 }
 0x775   : > { %v646_v61 = vsel %vm645_vm12, %v643_v59, %v644_v60  ;;  %p1155_p11 = scmp.ne.s32.totalorder %s883_s23, %s1154_s27  ;;  %p1162_p1 = scmp.lt.s32.totalorder %s1160_s29, %s1154_s27 }
 0x776   : > { %v648_v62 = vshra.s32 %v646_v61, 16  ;;  %v647_v25 = vand.u32 65535, %v646_v61 }
 0x777   : > { %p1156_p12 = pnand %p1155_p11, %p1307_p5  ;;  %p1163_p2 = por %p1162_p1, %p1161_p0 }
 0x778   : > { %v650_v63 = vcvt.s32.f32 %v648_v62  ;;  %v649_v27 = vcvt.s32.f32 %v647_v25 }
 0x779   : > { %p1157_p13 = pneg %p1156_p12 }
 0x77a   : > { %651 = vmax.xlane.f32.xlu0 %v650_v63 }
 0x77b   : > { %p1164_p3 = pnand %p1163_p2, %p1157_p13 }
 0x803   : > { %v652_v26 = vpop.xlane.xlu0 %651 }
 0x804   : > { %vm653_vm13 = vcmp.eq.f32.partialorder %v650_v63, %v652_v26  ;;  %v658_v37 = vcvt.f32.s32 %v652_v26 }
 0x805   : > { %v654_v28 = vsel %vm653_vm13, %v649_v27, -inf }
 0x806   : > { %655 = vmax.xlane.f32.xlu1 %v654_v28  ;;  %v659_v39 = vshll.u32 %v658_v37, 16 }
 0x88f   : > { %v656_v38 = vpop.xlane.xlu1 %655 }
 0x890   : > { %v657_v40 = vcvt.f32.s32 %v656_v38 }
 0x892   : > { %v660_v41 = vadd.s32 %v659_v39, %v657_v40 }
 0x894   : > { %vm661_vm14 = vcmp.eq.s32.totalorder %v1417_v54, %v660_v41  ;;  %v666_v42 = vsel %vm665_vm8, %v660_v41, %v1451_v46  ;;  %vm662_vm15 = vcmp.eq.s32.totalorder %v1420_v55, %v660_v41  ;;  %v775_v54 = vld [vmem:[%s1645_s5 + $0x8] sm:$0xff]  ;;  %v774_v55 = vld [vmem:[%s1645_s5] sm:$0xff] }
 0x895   : > { %858 = vst.msk [vmem:[%s344_s24] sm:$0xff] %vm857_vm9, %v666_v42  ;;  %v664_v43 = vsel %vm662_vm15, -inf, %v1457_v48  ;;  %v663_v44 = vsel %vm661_vm14, -inf, %v1455_v47  ;;  %1103 = vmatpush3.msra.mxu0 %v775_v54 }
 0x896   : > { %vm669_vm0 = vcmp.eq.f32.partialorder %v664_v43, -inf  ;;  %vm668_vm2 = vcmp.eq.f32.partialorder %v663_v44, -inf  ;;  %1104 = vmatprep.subr.mxu0 %v1216_v1 }
 0x897   : > { %1004 = vmatprep.mubr.msk.f32.mxu1 %vm669_vm0, %v1413_v52  ;;  %1105 = vmatpush3.msra.mxu0 %v774_v55 }
 0x898   : > { %1005 = vmatmul.mubr.msk.f32.vlgmr.msra.gmra.mxu1 %vm668_vm2, %v1411_v51  ;;  %v1006_v51 = vld [vmem:[%s1646_s6] ss:$0 sm:$0xff] }
 0x958   : > { %v1061_v45 = vpop.f32.mrf.mxu1 }
 0x95a   : > { %v1062_v46 = vpop.f32.mrf.mxu1 }
 0x95b   : > { %v1063_v47 = vadd.f32 %v1062_v46, %v1061_v45 }
 0x95d   : > { %1107 = vmatmul.mubr.msk.f32.vlgmr.msra.gmra.mxu0 %vm452_vm1, %v1063_v47 }
 0xa1d   : > { %v852_v1 = vpop.f32.mrf.mxu0 }
 0xa1e   : > { %v853_v52 = vadd.f32 %v1006_v51, %v852_v1 }
 0xa1f   : > { %v1108_v48 = vpop.f32.mrf.mxu0 }
 0xa20   : > { %856 = vst [vmem:[%s324_s22] sm:$0xff] %v853_v52 }
 0xa21   : > { %1167 = shalt.err (!%p1164_p3)
}
 0xa22   : > { %s1168_s17 = scalar_lea.hbm %s1605_s26, 128  ;;  %s1172_s22 = scalar_lea.hbm %s1647_s7, 256 }
 0xa23   : > { %p1169_p4 = scmp.ne.s32.totalorder %s1605_s26, %s1168_s17  ;;  %p1173_p9 = scmp.lt.s32.totalorder %s1605_s26, %s1647_s7 }
 0xa24   : > { %p1174_p10 = scmp.lt.s32.totalorder %s1172_s22, %s1168_s17 }
 0xa25   : > { %p1170_p7 = pnand %p1169_p4, %p1307_p5 }
 0xa26   : > { %p1175_p11 = por %p1174_p10, %p1173_p9 }
 0xa27   : > { %p1171_p8 = pneg %p1170_p7 }
 0xa29   : > { %p1176_p12 = pnand %p1175_p11, %p1171_p8 }
 0xa2b   : > { %1179 = shalt.err (!%p1176_p12)
}
 0xa2c   : > { %1109 = dma.vmem_to_hbm [thread:$0]  (%p1307_p5), %s883_s23, 128, %s1605_s26, %s861_s25  }
 0xa2d PF: > { %p1115_p13 = scmp.ge.s32.totalorder %s1214_s12, 2  ;;  %s900_s27 = sand.u32 1, %s1202_s30  }
 0xa2e   : > { %s901_s16 = scalar_lea.sflag [#allocation3], %s900_s27 }
 0xa2f   : > { %p1112_p0 = pnand %p1115_p13, %p1311_p6 }
 0xa31   : > { %p1113_p1 = pneg %p1112_p0 }
 0xa33   : > { %1197 = dma.done.wait (%p1113_p1), %s901_s16, 128  }
 0xa34   : > { %1199 = vsyncadd (%p1113_p1), %s901_s16, 4294967168  ;;  %p20_p2 = scmp.ge.s32.totalorder %s1294_s15, 4   ;;  %s1652_s30 = smov %s1206_s10 }
 0xa35   : > { %s1653_s10 = smov %s1210_s11  ;;  %s1654_s11 = smov %s1305_s18 }
 0xa36   : > { %s1655_s12 = smov %s1294_s15  ;;  %22 = sbr.rel (!%p20_p2) target bundleno = 3 (0x3), region = 107 }
 0xa3b   :  { %920 = vsyncpa [#allocation3], 1 }
 0xa3c   :  { %922 = vsyncpa [#allocation3 + $0x1], 1 }

</bundles_post_ra>
